<compile_context>
chip_gen: v5e
topology: v5e:2x2
jax: 0.10.0
libtpu: 0.0.40
codegen_flags: <defaults>
</compile_context>

<pallas_src>
import functools

import jax
import jax.numpy as jnp
from jax.experimental import pallas as pl
from jax.experimental.pallas import tpu as pltpu

D_IN, D_H1, D_H2, D_H3, D_OUT = 82, 256, 256, 128, 1


def _auto_bf16_epilogue():
    """bf16 VPU exists on v6e / v7x; older generations keep the f32 epilogue."""
    try:
        kind = jax.devices()[0].device_kind.lower()
    except Exception:  # pragma: no cover - conservative fallback
        return True
    return not any(tag in kind for tag in ("v2", "v3", "v4", "v5"))


def _value_mlp_kernel(x_ref,
                      w1_ref, b1_ref,
                      w2_ref, b2_ref,
                      w3_ref, b3_ref,
                      w4_ref, b4_ref,
                      o_ref,
                      *, bf16_epilogue):
    bf16 = jnp.bfloat16

    # x tile: (TB, 82) f32 or bf16.  MXU operands are bf16, accumulate in f32.
    x = x_ref[...].astype(bf16)

    def act(acc_f32):
        # Bias add already done in f32 by caller; ReLU + downcast for next MXU op.
        if bf16_epilogue:
            return jnp.maximum(acc_f32.astype(bf16), 0)       # bf16 VPU (v6e/v7x)
        return jnp.maximum(acc_f32, 0.0).astype(bf16)          # f32 VPU (v5e)

    # Linear(82, 256) + ReLU
    h = act(jnp.dot(x, w1_ref[...], preferred_element_type=jnp.float32)
            + b1_ref[...])

    # Linear(256, 256) + ReLU
    h = act(jnp.dot(h, w2_ref[...], preferred_element_type=jnp.float32)
            + b2_ref[...])

    # Linear(256, 128) + ReLU — epilogue kept f32 (feeds the VPU reduce, not MXU).
    h = jnp.dot(h, w3_ref[...], preferred_element_type=jnp.float32) + b3_ref[...]
    h = jnp.maximum(h, 0.0)

    # Linear(128, 1): N=1 matmul stays off the MXU -> broadcast mul + lane reduce.
    # w4_ref is the final weight column stored as a (1, 128) f32 row.
    out = jnp.sum(h * w4_ref[...], axis=-1, keepdims=True) + b4_ref[...]
    o_ref[...] = out.astype(o_ref.dtype)


@functools.partial(jax.jit, static_argnames=("tile_b", "bf16_epilogue"))
def value_forward(x, params, *, tile_b=1024, bf16_epilogue=None):
    """x: (B, 82) float32 (or bf16, accepted as-is). params: weights (in,out), biases (1,out)."""
    if bf16_epilogue is None:
        bf16_epilogue = _auto_bf16_epilogue()

    # Accept bf16 x directly (halves the only per-tile HBM stream); otherwise f32.
    if x.dtype != jnp.bfloat16:
        x = x.astype(jnp.float32)
    B = x.shape[0]

    # --- Tile selection ----------------------------------------------------
    b_rounded = ((B + 7) // 8) * 8
    TB = min(int(tile_b), b_rounded)
    TB = max(8, (TB // 8) * 8)                    # sublane rule: multiple of 8
    # Prefer >= 2 grid steps so both v7x TensorCores get work (cheap elsewhere).
    if b_rounded > 8 and b_rounded <= TB:
        TB = max(8, ((((b_rounded + 1) // 2) + 7) // 8) * 8)
    Bp = ((B + TB - 1) // TB) * TB
    if Bp != B:
        x = jnp.pad(x, ((0, Bp - B), (0, 0)))
    grid = (Bp // TB,)

    # --- Parameters --------------------------------------------------------
    # MXU weights to bf16 once at the call boundary (halves resident VMEM + DMA).
    w1 = params["w1"].astype(jnp.bfloat16)
    w2 = params["w2"].astype(jnp.bfloat16)
    w3 = params["w3"].astype(jnp.bfloat16)
    # Final layer stays f32 (VPU mul + reduce); stored as a (1, 128) row.
    w4_row = params["w4"].astype(jnp.float32).reshape(1, D_H3)
    b1 = params["b1"].astype(jnp.float32)
    b2 = params["b2"].astype(jnp.float32)
    b3 = params["b3"].astype(jnp.float32)
    b4 = params["b4"].astype(jnp.float32)

    # --- VMEM budget: ~2x of the per-tile footprint, clamped to safe bounds --
    bytes_w = 2 * 2 * (D_IN * D_H1 + D_H1 * D_H2 + D_H2 * D_H3)      # bf16, 2 bufs
    bytes_x = 2 * TB * D_IN * x.dtype.itemsize                        # double-buffered
    bytes_act = 2 * TB * (D_H1 + D_H2 + D_H3) * 4                     # f32 + bf16 temps
    bytes_out = 2 * TB * D_OUT * 4
    vmem_limit = int(min(48 * 2**20,
                         max(16 * 2**20,
                             2 * (bytes_w + bytes_x + bytes_act + bytes_out))))

    in_specs = [
        pl.BlockSpec((TB, D_IN), lambda i: (i, 0)),          # x: batch-tiled
        pl.BlockSpec((D_IN, D_H1), lambda i: (0, 0)),        # w1 (VMEM-resident)
        pl.BlockSpec((1, D_H1), lambda i: (0, 0)),           # b1
        pl.BlockSpec((D_H1, D_H2), lambda i: (0, 0)),        # w2
        pl.BlockSpec((1, D_H2), lambda i: (0, 0)),           # b2
        pl.BlockSpec((D_H2, D_H3), lambda i: (0, 0)),        # w3
        pl.BlockSpec((1, D_H3), lambda i: (0, 0)),           # b3
        pl.BlockSpec((1, D_H3), lambda i: (0, 0)),           # w4 row
        pl.BlockSpec((1, D_OUT), lambda i: (0, 0)),          # b4
    ]
    out_spec = pl.BlockSpec((TB, D_OUT), lambda i: (i, 0))

    kernel = functools.partial(_value_mlp_kernel, bf16_epilogue=bool(bf16_epilogue))

    out = pl.pallas_call(
        kernel,
        out_shape=jax.ShapeDtypeStruct((Bp, D_OUT), jnp.float32),
        grid=grid,
        in_specs=in_specs,
        out_specs=out_spec,
        compiler_params=pltpu.CompilerParams(
            dimension_semantics=("parallel",),
            vmem_limit_bytes=vmem_limit),
    )(x, w1, b1, w2, b2, w3, b3, w4_row, b4)

    return out[:B]


def init_params(key):
    """Deterministic init mimicking PyTorch nn.Linear default (uniform +/- 1/sqrt(fan_in))."""
    dims = [(D_IN, D_H1), (D_H1, D_H2), (D_H2, D_H3), (D_H3, D_OUT)]
    params = {}
    for i, (fan_in, fan_out) in enumerate(dims, start=1):
        key, kw, kb = jax.random.split(key, 3)
        bound = 1.0 / jnp.sqrt(float(fan_in))
        params[f"w{i}"] = jax.random.uniform(
            kw, (fan_in, fan_out), jnp.float32, -bound, bound)
        params[f"b{i}"] = jax.random.uniform(
            kb, (1, fan_out), jnp.float32, -bound, bound)
    return params


def value_forward_ref_bf16(x, params):
    """Pure-JAX reference matching the kernel's bf16-MXU / f32-accumulate semantics.

    Valid for both epilogue modes: max(cast(h),0) == cast(max(h,0)) for bf16.
    """
    bf = jnp.bfloat16
    h = jnp.dot(x.astype(bf), params["w1"].astype(bf),
                preferred_element_type=jnp.float32) + params["b1"]
    h = jnp.maximum(h, 0.0)
    h = jnp.dot(h.astype(bf), params["w2"].astype(bf),
                preferred_element_type=jnp.float32) + params["b2"]
    h = jnp.maximum(h, 0.0)
    h = jnp.dot(h.astype(bf), params["w3"].astype(bf),
                preferred_element_type=jnp.float32) + params["b3"]
    h = jnp.maximum(h, 0.0)
    return jnp.sum(h * params["w4"].reshape(1, -1), axis=-1, keepdims=True) + params["b4"]


def value_forward_ref_f32(x, params):
    """Pure f32 reference (PyTorch-equivalent semantics)."""
    h = jnp.maximum(x @ params["w1"] + params["b1"], 0.0)
    h = jnp.maximum(h @ params["w2"] + params["b2"], 0.0)
    h = jnp.maximum(h @ params["w3"] + params["b3"], 0.0)
    return h @ params["w4"] + params["b4"]


if __name__ == "__main__":
    key = jax.random.PRNGKey(0)
    key, kx, kx2 = jax.random.split(key, 3)
    params = init_params(key)

    # Small demo batch (single grid step).
    B = 8
    x = jax.random.normal(kx, (B, D_IN), jnp.float32)
    out = jax.block_until_ready(value_forward(x, params))
    assert out.shape == (B, 1)
    ref_bf16 = value_forward_ref_bf16(x, params)
    ref_f32 = value_forward_ref_f32(x, params)
    assert jnp.allclose(out, ref_bf16, atol=2e-3, rtol=2e-3)
    assert jnp.allclose(out, ref_f32, atol=5e-2, rtol=5e-2)

    # Exercise multi-tile grid + padding path (B not a multiple of the tile),
    # with a tile_b that is not a multiple of 8 (gets clamped internally).
    B2 = 300
    x2 = jax.random.normal(kx2, (B2, D_IN), jnp.float32)
    out2 = jax.block_until_ready(value_forward(x2, params, tile_b=100))
    assert out2.shape == (B2, 1)
    ref2 = value_forward_ref_bf16(x2, params)
    assert jnp.allclose(out2, ref2, atol=2e-3, rtol=2e-3)

    # bf16 input fast path (no forced f32 round-trip in the wrapper).
    x_bf = x.astype(jnp.bfloat16)
    out_bf = jax.block_until_ready(value_forward(x_bf, params))
    assert out_bf.shape == (B, 1)
    assert jnp.allclose(out_bf, value_forward_ref_bf16(x_bf, params),
                        atol=2e-3, rtol=2e-3)

    print("KERNEL_OK")
</pallas_src>

<mosaic_0001>
module attributes {stable_mosaic.version = 11 : i64} {
  func.func @_value_mlp_kernel(%arg0: i32, %arg1: memref<8x82xf32, #tpu.memory_space<vmem>>, %arg2: memref<82x256xbf16, #tpu.memory_space<vmem>>, %arg3: memref<1x256xf32, #tpu.memory_space<vmem>>, %arg4: memref<256x256xbf16, #tpu.memory_space<vmem>>, %arg5: memref<1x256xf32, #tpu.memory_space<vmem>>, %arg6: memref<256x128xbf16, #tpu.memory_space<vmem>>, %arg7: memref<1x128xf32, #tpu.memory_space<vmem>>, %arg8: memref<1x128xf32, #tpu.memory_space<vmem>>, %arg9: memref<1x1xf32, #tpu.memory_space<vmem>>, %arg10: memref<8x1xf32, #tpu.memory_space<vmem>>) attributes {dimension_semantics = [#tpu.dimension_semantics<parallel>], iteration_bounds = array<i64: 1>, scalar_prefetch = 0 : i64, scratch_operands = 0 : i64, tpu.core_type = #tpu.core_type<tc>, window_params = [{transform_indices = @transform_0, window_bounds = array<i64: 8, 82>}, {pipeline_mode = #tpu.pipeline_mode<synchronous>, transform_indices = @transform_1, window_bounds = array<i64: 82, 256>}, {pipeline_mode = #tpu.pipeline_mode<synchronous>, transform_indices = @transform_2, window_bounds = array<i64: 1, 256>}, {pipeline_mode = #tpu.pipeline_mode<synchronous>, transform_indices = @transform_3, window_bounds = array<i64: 256, 256>}, {pipeline_mode = #tpu.pipeline_mode<synchronous>, transform_indices = @transform_4, window_bounds = array<i64: 1, 256>}, {pipeline_mode = #tpu.pipeline_mode<synchronous>, transform_indices = @transform_5, window_bounds = array<i64: 256, 128>}, {pipeline_mode = #tpu.pipeline_mode<synchronous>, transform_indices = @transform_6, window_bounds = array<i64: 1, 128>}, {pipeline_mode = #tpu.pipeline_mode<synchronous>, transform_indices = @transform_7, window_bounds = array<i64: 1, 128>}, {pipeline_mode = #tpu.pipeline_mode<synchronous>, transform_indices = @transform_8, window_bounds = array<i64: 1, 1>}, {transform_indices = @transform_9, window_bounds = array<i64: 8, 1>}]} {
    %c0 = arith.constant 0 : index
    %c0_0 = arith.constant 0 : index
    %0 = vector.load %arg1[%c0, %c0_0] : memref<8x82xf32, #tpu.memory_space<vmem>>, vector<8x82xf32>
    %1 = arith.truncf %0 : vector<8x82xf32> to vector<8x82xbf16>
    %c0_1 = arith.constant 0 : index
    %c0_2 = arith.constant 0 : index
    %2 = vector.load %arg2[%c0_1, %c0_2] : memref<82x256xbf16, #tpu.memory_space<vmem>>, vector<82x256xbf16>
    %cst = arith.constant dense<0.000000e+00> : vector<8x256xf32>
    %3 = tpu.matmul %1, %2, %cst {dimension_numbers = #tpu.dot_dimension_numbers<[1], [0], [0], [1], [0, 0, 1, 1], [], []>} : vector<8x82xbf16>, vector<82x256xbf16>, vector<8x256xf32> -> vector<8x256xf32>
    %c0_3 = arith.constant 0 : index
    %c0_4 = arith.constant 0 : index
    %4 = vector.load %arg3[%c0_3, %c0_4] : memref<1x256xf32, #tpu.memory_space<vmem>>, vector<1x256xf32>
    %5 = vector.broadcast %4 : vector<1x256xf32> to vector<8x256xf32>
    %6 = arith.addf %3, %5 : vector<8x256xf32>
    %7 = arith.truncf %6 : vector<8x256xf32> to vector<8x256xbf16>
    %cst_5 = arith.constant 0.000000e+00 : bf16
    %8 = vector.broadcast %cst_5 : bf16 to vector<8x256xbf16>
    %9 = arith.maximumf %7, %8 : vector<8x256xbf16>
    %c0_6 = arith.constant 0 : index
    %c0_7 = arith.constant 0 : index
    %10 = vector.load %arg4[%c0_6, %c0_7] : memref<256x256xbf16, #tpu.memory_space<vmem>>, vector<256x256xbf16>
    %cst_8 = arith.constant dense<0.000000e+00> : vector<8x256xf32>
    %11 = tpu.matmul %9, %10, %cst_8 {dimension_numbers = #tpu.dot_dimension_numbers<[1], [0], [0], [1], [0, 0, 1, 1], [], []>} : vector<8x256xbf16>, vector<256x256xbf16>, vector<8x256xf32> -> vector<8x256xf32>
    %c0_9 = arith.constant 0 : index
    %c0_10 = arith.constant 0 : index
    %12 = vector.load %arg5[%c0_9, %c0_10] : memref<1x256xf32, #tpu.memory_space<vmem>>, vector<1x256xf32>
    %13 = vector.broadcast %12 : vector<1x256xf32> to vector<8x256xf32>
    %14 = arith.addf %11, %13 : vector<8x256xf32>
    %15 = arith.truncf %14 : vector<8x256xf32> to vector<8x256xbf16>
    %cst_11 = arith.constant 0.000000e+00 : bf16
    %16 = vector.broadcast %cst_11 : bf16 to vector<8x256xbf16>
    %17 = arith.maximumf %15, %16 : vector<8x256xbf16>
    %c0_12 = arith.constant 0 : index
    %c0_13 = arith.constant 0 : index
    %18 = vector.load %arg6[%c0_12, %c0_13] : memref<256x128xbf16, #tpu.memory_space<vmem>>, vector<256x128xbf16>
    %cst_14 = arith.constant dense<0.000000e+00> : vector<8x128xf32>
    %19 = tpu.matmul %17, %18, %cst_14 {dimension_numbers = #tpu.dot_dimension_numbers<[1], [0], [0], [1], [0, 0, 1, 1], [], []>} : vector<8x256xbf16>, vector<256x128xbf16>, vector<8x128xf32> -> vector<8x128xf32>
    %c0_15 = arith.constant 0 : index
    %c0_16 = arith.constant 0 : index
    %20 = vector.load %arg7[%c0_15, %c0_16] : memref<1x128xf32, #tpu.memory_space<vmem>>, vector<1x128xf32>
    %21 = vector.broadcast %20 : vector<1x128xf32> to vector<8x128xf32>
    %22 = arith.addf %19, %21 : vector<8x128xf32>
    %cst_17 = arith.constant 0.000000e+00 : f32
    %23 = vector.broadcast %cst_17 : f32 to vector<8x128xf32>
    %24 = arith.maximumf %22, %23 : vector<8x128xf32>
    %c0_18 = arith.constant 0 : index
    %c0_19 = arith.constant 0 : index
    %25 = vector.load %arg8[%c0_18, %c0_19] : memref<1x128xf32, #tpu.memory_space<vmem>>, vector<1x128xf32>
    %26 = vector.broadcast %25 : vector<1x128xf32> to vector<8x128xf32>
    %27 = arith.mulf %24, %26 : vector<8x128xf32>
    %cst_20 = arith.constant dense<0.000000e+00> : vector<8xf32>
    %28 = vector.multi_reduction <add>, %27, %cst_20 [1] : vector<8x128xf32> to vector<8xf32>
    %29 = vector.shape_cast %28 : vector<8xf32> to vector<8x1xf32>
    %c0_21 = arith.constant 0 : index
    %c0_22 = arith.constant 0 : index
    %30 = vector.load %arg9[%c0_21, %c0_22] : memref<1x1xf32, #tpu.memory_space<vmem>>, vector<1x1xf32>
    %31 = vector.broadcast %30 : vector<1x1xf32> to vector<8x1xf32>
    %32 = arith.addf %29, %31 : vector<8x1xf32>
    %c0_23 = arith.constant 0 : index
    %c0_24 = arith.constant 0 : index
    %33 = vector.load %arg10[%c0_23, %c0_24] : memref<8x1xf32, #tpu.memory_space<vmem>>, vector<8x1xf32>
    tpu.vector_store %arg10[%c0_23, %c0_24], %32 {strides = array<i32>} : memref<8x1xf32, #tpu.memory_space<vmem>>, vector<8x1xf32>,
    return
  }
  func.func @transform_0(%arg0: i32) -> (i32, i32) {
    %c0_i32 = arith.constant 0 : i32
    %c0_i32_0 = arith.constant 0 : i32
    return %arg0, %c0_i32 : i32, i32
  }
  func.func @transform_1(%arg0: i32) -> (i32, i32) {
    %c0_i32 = arith.constant 0 : i32
    %c0_i32_0 = arith.constant 0 : i32
    %c0_i32_1 = arith.constant 0 : i32
    return %c0_i32, %c0_i32_0 : i32, i32
  }
  func.func @transform_2(%arg0: i32) -> (i32, i32) {
    %c0_i32 = arith.constant 0 : i32
    %c0_i32_0 = arith.constant 0 : i32
    %c0_i32_1 = arith.constant 0 : i32
    return %c0_i32, %c0_i32_0 : i32, i32
  }
  func.func @transform_3(%arg0: i32) -> (i32, i32) {
    %c0_i32 = arith.constant 0 : i32
    %c0_i32_0 = arith.constant 0 : i32
    %c0_i32_1 = arith.constant 0 : i32
    return %c0_i32, %c0_i32_0 : i32, i32
  }
  func.func @transform_4(%arg0: i32) -> (i32, i32) {
    %c0_i32 = arith.constant 0 : i32
    %c0_i32_0 = arith.constant 0 : i32
    %c0_i32_1 = arith.constant 0 : i32
    return %c0_i32, %c0_i32_0 : i32, i32
  }
  func.func @transform_5(%arg0: i32) -> (i32, i32) {
    %c0_i32 = arith.constant 0 : i32
    %c0_i32_0 = arith.constant 0 : i32
    %c0_i32_1 = arith.constant 0 : i32
    return %c0_i32, %c0_i32_0 : i32, i32
  }
  func.func @transform_6(%arg0: i32) -> (i32, i32) {
    %c0_i32 = arith.constant 0 : i32
    %c0_i32_0 = arith.constant 0 : i32
    %c0_i32_1 = arith.constant 0 : i32
    return %c0_i32, %c0_i32_0 : i32, i32
  }
  func.func @transform_7(%arg0: i32) -> (i32, i32) {
    %c0_i32 = arith.constant 0 : i32
    %c0_i32_0 = arith.constant 0 : i32
    %c0_i32_1 = arith.constant 0 : i32
    return %c0_i32, %c0_i32_0 : i32, i32
  }
  func.func @transform_8(%arg0: i32) -> (i32, i32) {
    %c0_i32 = arith.constant 0 : i32
    %c0_i32_0 = arith.constant 0 : i32
    %c0_i32_1 = arith.constant 0 : i32
    return %c0_i32, %c0_i32_0 : i32, i32
  }
  func.func @transform_9(%arg0: i32) -> (i32, i32) {
    %c0_i32 = arith.constant 0 : i32
    %c0_i32_0 = arith.constant 0 : i32
    return %arg0, %c0_i32 : i32, i32
  }
}

</mosaic_0001>

<bundles_post_ra>
// kernel: value_forward.1
= control target key start
LH: loop header
LB: loop body
LE: loop exit
PB: predicated region body
PF: predicated region fallthrough
CT: control target
= control target key end

     0   :  { %vm113_vm0 = vcmask 1040384   ;;  %vm109_vm1 = vcmask 670720   ;;  %vm581_vm2 = vcmask 7168   ;;  %s1256_s1 = inlined_call_operand.vmem [shape: bf16[82,256], index: 1, kind: input, shape index: {}]   ;;  %s1257_s3 = inlined_call_operand.vmem [shape: bf16[256,256], index: 3, kind: input, shape index: {}]   ;;  %s1258_s0 = inlined_call_operand.vmem [shape: f32[8,82], index: 0, kind: input, shape index: {}]   ;;  %s1259_s5 = inlined_call_operand.vmem [shape: bf16[256,128], index: 5, kind: input, shape index: {}]   ;;  %s1260_s2 = inlined_call_operand.vmem [shape: f32[1,256], index: 2, kind: input, shape index: {}]   ;;  %s1261_s4 = inlined_call_operand.vmem [shape: f32[1,256], index: 4, kind: input, shape index: {}]   ;;  %s1262_s6 = inlined_call_operand.vmem [shape: f32[1,128], index: 6, kind: input, shape index: {}]   ;;  %s1263_s7 = inlined_call_operand.vmem [shape: f32[1,128], index: 7, kind: input, shape index: {}]   ;;  %s1264_s8 = inlined_call_operand.<no memory space> [shape: f32[1,1], index: 8, kind: input, shape index: {}]   ;;  %s1265_s9 = inlined_call_operand.vmem [shape: f32[8,1], index: 9, kind: output, shape index: {}]  }
   0x1   :  { %v47_v0 = vld [vmem:[%s1256_s1 + $0x50] sm:$0x11]  ;;  %v621_v3 = vld [vmem:[%s1256_s1 + $0x40] sm:$0xf]  ;;  %v830_v6 = vld [vmem:[%s1256_s1 + $0x44] sm:$0xf0] }
   0x2   :  { %v85_v1 = vunpack.c.l.b16 %v47_v0  ;;  %v86_v2 = vunpack.c.h.b16 %v47_v0  ;;  %v829_v7 = vld [vmem:[%s1256_s1 + $0x44] sm:$0xf]  ;;  %v623_v8 = vld [vmem:[%s1256_s1 + $0x48] sm:$0xf0]  ;;  %v622_v11 = vor.u32 %v830_v6, %v621_v3  ;;  %v613_v13 = vld [vmem:[%s1256_s1 + $0x30] sm:$0xf] }
   0x3   :  { %v626_v12 = vor.u32 %v829_v7, %v623_v8  ;;  %v828_v14 = vld [vmem:[%s1256_s1 + $0x34] sm:$0xf0]  ;;  %v827_v15 = vld [vmem:[%s1256_s1 + $0x34] sm:$0xf]  ;;  %v615_v16 = vld [vmem:[%s1256_s1 + $0x38] sm:$0xf0] }
   0x4   :  { %v97_v4 = vpack.c.b16 %v85_v1, %v85_v1  ;;  %v98_v5 = vpack.c.b16 %v86_v2, %v86_v2  ;;  %v687_v17 = vld [vmem:[%s1257_s3 + $0x70] sm:$0xf]  ;;  %v846_v18 = vld [vmem:[%s1257_s3 + $0x74] sm:$0xf0]  ;;  %v605_v21 = vld [vmem:[%s1256_s1 + $0x20] sm:$0xf]  ;;  %v614_v25 = vor.u32 %v828_v14, %v613_v13  ;;  %v618_v26 = vor.u32 %v827_v15, %v615_v16 }
   0x5   :  { %v751_v19 = vld [vmem:[%s1257_s3 + $0xf0] sm:$0xf]  ;;  %v862_v20 = vld [vmem:[%s1257_s3 + $0xf4] sm:$0xf0]  ;;  %v826_v22 = vld [vmem:[%s1256_s1 + $0x24] sm:$0xf0]  ;;  %v688_v23 = vor.u32 %v846_v18, %v687_v17 }
   0x6   :  { %v115_v9 = vsel %vm113_vm0, %v97_v4, 0  ;;  %v118_v10 = vsel %vm113_vm0, %v98_v5, 0  ;;  %v752_v24 = vor.u32 %v862_v20, %v751_v19  ;;  %v825_v27 = vld [vmem:[%s1256_s1 + $0x24] sm:$0xf]  ;;  %v679_v28 = vld [vmem:[%s1257_s3 + $0x60] sm:$0xf]  ;;  %v606_v38 = vor.u32 %v826_v22, %v605_v21 }
   0x7   :  { %122 = vmatpush.bf16.msra.mxu0 %v115_v9  ;;  %135 = vmatpush.bf16.msra.mxu1 %v118_v10  ;;  %v844_v29 = vld [vmem:[%s1257_s3 + $0x64] sm:$0xf0]  ;;  %v607_v30 = vld [vmem:[%s1256_s1 + $0x28] sm:$0xf0]  ;;  %v743_v32 = vld [vmem:[%s1257_s3 + $0xe0] sm:$0xf] }
   0x8   :  { %351 = vmatpush.bf16.msra.mxu2 %v688_v23  ;;  %364 = vmatpush.bf16.msra.mxu3 %v752_v24  ;;  %v680_v31 = vor.u32 %v844_v29, %v679_v28  ;;  %v860_v33 = vld [vmem:[%s1257_s3 + $0xe4] sm:$0xf0]  ;;  %v671_v35 = vld [vmem:[%s1257_s3 + $0x50] sm:$0xf]  ;;  %v842_v36 = vld [vmem:[%s1257_s3 + $0x54] sm:$0xf0]  ;;  %v610_v39 = vor.u32 %v825_v27, %v607_v30 }
   0x9   :  { %v744_v34 = vor.u32 %v860_v33, %v743_v32  ;;  %v735_v37 = vld [vmem:[%s1257_s3 + $0xd0] sm:$0xf]  ;;  %v824_v41 = vld [vmem:[%s1256_s1 + $0x14] sm:$0xf0]  ;;  %v823_v43 = vld [vmem:[%s1256_s1 + $0x14] sm:$0xf]  ;;  %v672_v45 = vor.u32 %v842_v36, %v671_v35 }
   0xa   :  { %v597_v40 = vld [vmem:[%s1256_s1 + $0x10] sm:$0xf]  ;;  %v858_v42 = vld [vmem:[%s1257_s3 + $0xd4] sm:$0xf0]  ;;  %v599_v44 = vld [vmem:[%s1256_s1 + $0x18] sm:$0xf0] }
   0xb   :  { %123 = vmatpush.bf16.msra.mxu0 %v622_v11  ;;  %136 = vmatpush.bf16.msra.mxu1 %v626_v12  ;;  %v736_v46 = vor.u32 %v858_v42, %v735_v37  ;;  %v663_v47 = vld [vmem:[%s1257_s3 + $0x40] sm:$0xf]  ;;  %v840_v48 = vld [vmem:[%s1257_s3 + $0x44] sm:$0xf0]  ;;  %v598_v51 = vor.u32 %v824_v41, %v597_v40  ;;  %v602_v52 = vor.u32 %v823_v43, %v599_v44  ;;  %v821_v55 = vld [vmem:[%s1256_s1 + $0x4] sm:$0xf] }
   0xc   :  { %352 = vmatpush.bf16.msra.mxu2 %v680_v31  ;;  %365 = vmatpush.bf16.msra.mxu3 %v744_v34  ;;  %v727_v49 = vld [vmem:[%s1257_s3 + $0xc0] sm:$0xf]  ;;  %v856_v50 = vld [vmem:[%s1257_s3 + $0xc4] sm:$0xf0]  ;;  %v591_v56 = vld [vmem:[%s1256_s1 + $0x8] sm:$0xf0]  ;;  %v664_v59 = vor.u32 %v840_v48, %v663_v47 }
   0xd   :  { %v589_v53 = vld [vmem:[%s1256_s1] sm:$0xf]  ;;  %v822_v54 = vld [vmem:[%s1256_s1 + $0x4] sm:$0xf0]  ;;  %v845_v57 = vld [vmem:[%s1257_s3 + $0x74] sm:$0xf]  ;;  %v728_v60 = vor.u32 %v856_v50, %v727_v49  ;;  %v594_v4 = vor.u32 %v821_v55, %v591_v56 }
   0xe   :  { %v689_v58 = vld [vmem:[%s1257_s3 + $0x78] sm:$0xf0]  ;;  %v861_v61 = vld [vmem:[%s1257_s3 + $0xf4] sm:$0xf]  ;;  %v655_v63 = vld [vmem:[%s1257_s3 + $0x30] sm:$0xf]  ;;  %v590_v3 = vor.u32 %v822_v54, %v589_v53 }
   0xf   :  { %124 = vmatpush.bf16.msra.mxu0 %v614_v25  ;;  %137 = vmatpush.bf16.msra.mxu1 %v618_v26  ;;  %v753_v62 = vld [vmem:[%s1257_s3 + $0xf8] sm:$0xf0]  ;;  %v838_v0 = vld [vmem:[%s1257_s3 + $0x34] sm:$0xf0]  ;;  %v719_v1 = vld [vmem:[%s1257_s3 + $0xb0] sm:$0xf]  ;;  %v692_v6 = vor.u32 %v845_v57, %v689_v58 }
  0x10   :  { %353 = vmatpush.bf16.msra.mxu2 %v672_v45  ;;  %366 = vmatpush.bf16.msra.mxu3 %v736_v46  ;;  %v854_v2 = vld [vmem:[%s1257_s3 + $0xb4] sm:$0xf0]  ;;  %v35_v5 = vld [vmem:[%s1258_s0] sm:$0xff]  ;;  %v756_v7 = vor.u32 %v861_v61, %v753_v62  ;;  %v681_v9 = vld [vmem:[%s1257_s3 + $0x68] sm:$0xf0]  ;;  %v656_v12 = vor.u32 %v838_v0, %v655_v63 }
  0x11   :  { %v843_v8 = vld [vmem:[%s1257_s3 + $0x64] sm:$0xf]  ;;  %v745_v11 = vld [vmem:[%s1257_s3 + $0xe8] sm:$0xf0]  ;;  %v720_v13 = vor.u32 %v854_v2, %v719_v1  ;;  %v647_v14 = vld [vmem:[%s1257_s3 + $0x20] sm:$0xf]  ;;  %v36_v15 = vpack.c.bf16 %v35_v5, %v35_v5 }
  0x12   :  { %v859_v10 = vld [vmem:[%s1257_s3 + $0xe4] sm:$0xf]  ;;  %v836_v16 = vld [vmem:[%s1257_s3 + $0x24] sm:$0xf0]  ;;  %v711_v17 = vld [vmem:[%s1257_s3 + $0xa0] sm:$0xf]  ;;  %v684_v19 = vor.u32 %v843_v8, %v681_v9 }
  0x13   :  { %125 = vmatpush.bf16.msra.mxu0 %v606_v38  ;;  %138 = vmatpush.bf16.msra.mxu1 %v610_v39  ;;  %v852_v18 = vld [vmem:[%s1257_s3 + $0xa4] sm:$0xf0]  ;;  %v748_v20 = vor.u32 %v859_v10, %v745_v11  ;;  %v841_v21 = vld [vmem:[%s1257_s3 + $0x54] sm:$0xf]  ;;  %v673_v22 = vld [vmem:[%s1257_s3 + $0x58] sm:$0xf0]  ;;  %v648_v25 = vor.u32 %v836_v16, %v647_v14 }
  0x14   :  { %354 = vmatpush.bf16.msra.mxu2 %v664_v59  ;;  %367 = vmatpush.bf16.msra.mxu3 %v728_v60  ;;  %v857_v23 = vld [vmem:[%s1257_s3 + $0xd4] sm:$0xf]  ;;  %v737_v24 = vld [vmem:[%s1257_s3 + $0xd8] sm:$0xf0]  ;;  %v712_v26 = vor.u32 %v852_v18, %v711_v17  ;;  %v676_v27 = vor.u32 %v841_v21, %v673_v22  ;;  %v839_v29 = vld [vmem:[%s1257_s3 + $0x44] sm:$0xf] }
  0x15   :  { %v740_v28 = vor.u32 %v857_v23, %v737_v24  ;;  %v665_v30 = vld [vmem:[%s1257_s3 + $0x48] sm:$0xf0]  ;;  %v855_v31 = vld [vmem:[%s1257_s3 + $0xc4] sm:$0xf]  ;;  %v837_v35 = vld [vmem:[%s1257_s3 + $0x34] sm:$0xf] }
  0x16   :  { %v729_v32 = vld [vmem:[%s1257_s3 + $0xc8] sm:$0xf0]  ;;  %v668_v33 = vor.u32 %v839_v29, %v665_v30  ;;  %v657_v36 = vld [vmem:[%s1257_s3 + $0x38] sm:$0xf0]  ;;  %v853_v37 = vld [vmem:[%s1257_s3 + $0xb4] sm:$0xf] }
  0x17   :  { %126 = vmatpush.bf16.msra.mxu0 %v598_v51  ;;  %139 = vmatpush.bf16.msra.mxu1 %v602_v52  ;;  %v732_v34 = vor.u32 %v855_v31, %v729_v32  ;;  %v721_v38 = vld [vmem:[%s1257_s3 + $0xb8] sm:$0xf0]  ;;  %v660_v39 = vor.u32 %v837_v35, %v657_v36  ;;  %v835_v41 = vld [vmem:[%s1257_s3 + $0x24] sm:$0xf]  ;;  %v649_v42 = vld [vmem:[%s1257_s3 + $0x28] sm:$0xf0] }
  0x18   :  { %355 = vmatpush.bf16.msra.mxu2 %v656_v12  ;;  %368 = vmatpush.bf16.msra.mxu3 %v720_v13  ;;  %v724_v40 = vor.u32 %v853_v37, %v721_v38  ;;  %v851_v43 = vld [vmem:[%s1257_s3 + $0xa4] sm:$0xf]  ;;  %v713_v44 = vld [vmem:[%s1257_s3 + $0xa8] sm:$0xf0]  ;;  %v652_v45 = vor.u32 %v835_v41, %v649_v42  ;;  %v639_v47 = vld [vmem:[%s1257_s3 + $0x10] sm:$0xf] }
  0x19   :  { %v716_v46 = vor.u32 %v851_v43, %v713_v44  ;;  %v834_v48 = vld [vmem:[%s1257_s3 + $0x14] sm:$0xf0]  ;;  %v703_v49 = vld [vmem:[%s1257_s3 + $0x90] sm:$0xf]  ;;  %v833_v52 = vld [vmem:[%s1257_s3 + $0x14] sm:$0xf] }
  0x1a   :  { %v640_v50 = vor.u32 %v834_v48, %v639_v47  ;;  %v850_v51 = vld [vmem:[%s1257_s3 + $0x94] sm:$0xf0]  ;;  %v641_v53 = vld [vmem:[%s1257_s3 + $0x18] sm:$0xf0]  ;;  %v849_v56 = vld [vmem:[%s1257_s3 + $0x94] sm:$0xf] }
  0x1b   :  { %127 = vmatpush.bf16.msra.mxu0 %v590_v3  ;;  %140 = vmatpush.bf16.msra.mxu1 %v594_v4  ;;  %v704_v54 = vor.u32 %v850_v51, %v703_v49  ;;  %v644_v55 = vor.u32 %v833_v52, %v641_v53  ;;  %v705_v57 = vld [vmem:[%s1257_s3 + $0x98] sm:$0xf0]  ;;  %v631_v59 = vld [vmem:[%s1257_s3] sm:$0xf]  ;;  %v832_v60 = vld [vmem:[%s1257_s3 + $0x4] sm:$0xf0] }
  0x1c   :  { %356 = vmatpush.bf16.msra.mxu2 %v648_v25  ;;  %369 = vmatpush.bf16.msra.mxu3 %v712_v26  ;;  %v708_v58 = vor.u32 %v849_v56, %v705_v57  ;;  %v695_v61 = vld [vmem:[%s1257_s3 + $0x80] sm:$0xf]  ;;  %v632_v62 = vor.u32 %v832_v60, %v631_v59  ;;  %v848_v63 = vld [vmem:[%s1257_s3 + $0x84] sm:$0xf0]  ;;  %v831_v0 = vld [vmem:[%s1257_s3 + $0x4] sm:$0xf] }
  0x1d   :  { %v633_v1 = vld [vmem:[%s1257_s3 + $0x8] sm:$0xf0]  ;;  %v696_v2 = vor.u32 %v848_v63, %v695_v61  ;;  %v847_v4 = vld [vmem:[%s1257_s3 + $0x84] sm:$0xf]  ;;  %v870_v8 = vld [vmem:[%s1259_s5 + $0x38] sm:$0xff] }
  0x1e   :  { %627 = vmatmul.msk.bf16.vlgmr.msra.gmra.mxu0 %vm109_vm1, %v36_v15  ;;  %628 = vmatmul.msk.bf16.vlgmr.msra.gmra.mxu1 %vm109_vm1, %v36_v15  ;;  %v636_v3 = vor.u32 %v831_v0, %v633_v1  ;;  %v697_v5 = vld [vmem:[%s1257_s3 + $0x88] sm:$0xf0]  ;;  %v877_v9 = vld [vmem:[%s1259_s5 + $0x70] sm:$0xff]  ;;  %v875_v13 = vld [vmem:[%s1259_s5 + $0x60] sm:$0xff] }
  0x1f   :  { %377 = vmatpush.bf16.msrb.mxu0 %v692_v6  ;;  %390 = vmatpush.bf16.msrb.mxu1 %v756_v7  ;;  %v700_v6 = vor.u32 %v847_v4, %v697_v5  ;;  %v878_v7 = vld [vmem:[%s1259_s5 + $0x78] sm:$0xff]  ;;  %v869_v10 = vld [vmem:[%s1259_s5 + $0x30] sm:$0xff]  ;;  %v876_v11 = vld [vmem:[%s1259_s5 + $0x68] sm:$0xff] }
  0x20   :  { %357 = vmatpush.bf16.msra.mxu2 %v640_v50  ;;  %370 = vmatpush.bf16.msra.mxu3 %v704_v54  ;;  %v868_v12 = vld [vmem:[%s1259_s5 + $0x28] sm:$0xff]  ;;  %v867_v14 = vld [vmem:[%s1259_s5 + $0x20] sm:$0xff]  ;;  %v874_v15 = vld [vmem:[%s1259_s5 + $0x58] sm:$0xff] }
  0x21   :  { %v48_v16 = vld [vmem:[%s1260_s2] sm:$0x3]  ;;  %v873_v17 = vld [vmem:[%s1259_s5 + $0x50] sm:$0xff]  ;;  %v866_v30 = vld [vmem:[%s1259_s5 + $0x18] sm:$0xff] }
  0x22   :  { %v50_v18 = vperm.slane %v48_v16, 0  ;;  %v872_v31 = vld [vmem:[%s1259_s5 + $0x48] sm:$0xff]  ;;  %v865_v32 = vld [vmem:[%s1259_s5 + $0x10] sm:$0xff]  ;;  %v863_v35 = vld [vmem:[%s1259_s5] sm:$0xff] }
  0x23   :  { %378 = vmatpush.bf16.msrb.mxu0 %v684_v19  ;;  %391 = vmatpush.bf16.msrb.mxu1 %v748_v20  ;;  %v51_v19 = vperm.slane %v48_v16, 1  ;;  %v185_v36 = vld [vmem:[%s1261_s4] sm:$0x3] }
  0x24   :  { %358 = vmatpush.bf16.msra.mxu2 %v632_v62  ;;  %371 = vmatpush.bf16.msra.mxu3 %v696_v2  ;;  %v188_v37 = vperm.slane %v185_v36, 1  ;;  %v187_v41 = vperm.slane %v185_v36, 0  ;;  %v879_v57 = vld [vmem:[%s1262_s6] ss:$0 sm:$0xff] }
  0x25   :  { %v880_v62 = vld [vmem:[%s1263_s7] ss:$0 sm:$0xff] }
  0x27   :  { %379 = vmatpush.bf16.msrb.mxu0 %v676_v27  ;;  %392 = vmatpush.bf16.msrb.mxu1 %v740_v28 }
  0x28   :  { %555 = vmatpush.bf16.msrb.mxu3 %v878_v7  ;;  %542 = vmatpush.bf16.msrb.mxu2 %v870_v8 }
  0x2b   :  { %380 = vmatpush.bf16.msrb.mxu0 %v668_v33  ;;  %393 = vmatpush.bf16.msrb.mxu1 %v732_v34  ;;  %v871_v33 = vld [vmem:[%s1259_s5 + $0x40] sm:$0xff]  ;;  %v864_v34 = vld [vmem:[%s1259_s5 + $0x8] sm:$0xff] }
  0x2c   :  { %556 = vmatpush.bf16.msrb.mxu3 %v877_v9  ;;  %543 = vmatpush.bf16.msrb.mxu2 %v869_v10 }
  0x2f   :  { %381 = vmatpush.bf16.msrb.mxu0 %v660_v39  ;;  %394 = vmatpush.bf16.msrb.mxu1 %v724_v40 }
  0x30   :  { %557 = vmatpush.bf16.msrb.mxu3 %v876_v11  ;;  %544 = vmatpush.bf16.msrb.mxu2 %v868_v12 }
  0x33   :  { %382 = vmatpush.bf16.msrb.mxu0 %v652_v45  ;;  %395 = vmatpush.bf16.msrb.mxu1 %v716_v46 }
  0x34   :  { %558 = vmatpush.bf16.msrb.mxu3 %v875_v13  ;;  %545 = vmatpush.bf16.msrb.mxu2 %v867_v14 }
  0x37   :  { %383 = vmatpush.bf16.msrb.mxu0 %v644_v55  ;;  %396 = vmatpush.bf16.msrb.mxu1 %v708_v58  ;;  %v14_v55 = vstv %s1264_s8 }
  0x38   :  { %559 = vmatpush.bf16.msrb.mxu3 %v874_v15  ;;  %546 = vmatpush.bf16.msrb.mxu2 %v866_v30  ;;  %15 = vst [vmem:[#allocation2] sm:$0x1] %v14_v55 }
  0x3b   :  { %384 = vmatpush.bf16.msrb.mxu0 %v636_v3  ;;  %397 = vmatpush.bf16.msrb.mxu1 %v700_v6 }
  0x3c   :  { %560 = vmatpush.bf16.msrb.mxu3 %v873_v17  ;;  %547 = vmatpush.bf16.msrb.mxu2 %v865_v32 }
  0x3f   :  { %v881_v2 = vld [vmem:[#allocation2] ss:$0 sm:$0xff] }
  0x40   :  { %561 = vmatpush.bf16.msrb.mxu3 %v872_v31  ;;  %548 = vmatpush.bf16.msrb.mxu2 %v864_v34 }
  0x44   :  { %562 = vmatpush.bf16.msrb.mxu3 %v871_v33  ;;  %549 = vmatpush.bf16.msrb.mxu2 %v863_v35 }
  0x9b   :  { %v129_v20 = vpop.f32.mrf.mxu0  ;;  %v142_v21 = vpop.f32.mrf.mxu1 }
  0x9c   :  { %v130_v22 = vadd.f32 %v129_v20, %v50_v18  ;;  %v143_v23 = vadd.f32 %v142_v21, %v51_v19 }
  0x9e   :  { %v149_v24 = vmax.f32 %v130_v22, 0.0  ;;  %v150_v25 = vmax.f32 %v143_v23, 0.0 }
  0xa0   :  { %v151_v26 = vpack.c.bf16 %v149_v24, %v149_v24  ;;  %v152_v27 = vpack.c.bf16 %v150_v25, %v150_v25 }
  0xa2   :  { %359 = vmatmul.bf16.vlgmr.msra.gmra.mxu2 %v151_v26  ;;  %372 = vmatmul.bf16.vlgmr.msra.gmra.mxu3 %v152_v27 }
  0xa3   :  { %385 = vmatmul.bf16.vlgmr.msrb.gmra.mxu0 %v151_v26  ;;  %398 = vmatmul.bf16.vlgmr.msrb.gmra.mxu1 %v152_v27  ;;  %v131_v28 = vpop.f32.mrf.mxu0  ;;  %v144_v29 = vpop.f32.mrf.mxu1 }
 0x120   :  { %v386_v38 = vpop.f32.mrf.mxu0  ;;  %v399_v39 = vpop.f32.mrf.mxu1 }
 0x121   :  { %v387_v40 = vadd.f32 %v386_v38, %v188_v37 }
 0x123   :  { %v400_v42 = vadd.f32 %v399_v39, %v387_v40 }
 0x125   :  { %v407_v43 = vmax.f32 %v400_v42, 0.0  ;;  %v360_v44 = vpop.f32.mrf.mxu2  ;;  %v373_v45 = vpop.f32.mrf.mxu3 }
 0x126   :  { %v361_v46 = vadd.f32 %v360_v44, %v187_v41 }
 0x127   :  { %v409_v47 = vpack.c.bf16 %v407_v43, %v407_v43 }
 0x128   :  { %v374_v48 = vadd.f32 %v373_v45, %v361_v46  ;;  %v388_v49 = vpop.f32.mrf.mxu0  ;;  %v401_v50 = vpop.f32.mrf.mxu1 }
 0x129   :  { %563 = vmatmul.bf16.vlgmr.msrb.gmra.mxu3 %v409_v47 }
 0x12a   :  { %v406_v51 = vmax.f32 %v374_v48, 0.0 }
 0x12c   :  { %v408_v52 = vpack.c.bf16 %v406_v51, %v406_v51 }
 0x12d   :  { %v362_v53 = vpop.f32.mrf.mxu2  ;;  %v375_v54 = vpop.f32.mrf.mxu3 }
 0x12e   :  { %550 = vmatmul.bf16.vlgmr.msrb.gmra.mxu2 %v408_v52 }
 0x1ac   :  { %v564_v56 = vpop.f32.mrf.mxu3 }
 0x1b1   :  { %v551_v58 = vpop.f32.mrf.mxu2 }
 0x1b2   :  { %v552_v59 = vadd.f32 %v879_v57, %v551_v58 }
 0x1b4   :  { %v566_v60 = vpop.f32.mrf.mxu3  ;;  %v565_v61 = vadd.f32 %v564_v56, %v552_v59 }
 0x1b6   :  { %v568_v63 = vmax.f32 %v565_v61, 0.0 }
 0x1b8   :  { %v573_v0 = vmul.f32 %v880_v62, %v568_v63 }
 0x1b9   :  { %v553_v1 = vpop.f32.mrf.mxu2 }
 0x1ba   :  { %574 = vadd.xlane.f32.xlu0 %v573_v0 }
 0x22d   :  { %v575_v3 = vpop.xlane.xlu0 %574 }
 0x22e   :  { %v580_v4 = vadd.f32 %v881_v2, %v575_v3 }
 0x230   :  { %582 = vst.msk [vmem:[%s1265_s9] sm:$0xff] %vm581_vm2, %v580_v4 }

</bundles_post_ra>
